<compile_context>
chip_gen: v7x
topology: tpu7x:2x2x1
jax: 0.10.0
libtpu: 0.0.40
codegen_flags: <defaults>
</compile_context>

<pallas_src>
import functools

import numpy as np
import jax
import jax.numpy as jnp
from jax.experimental import pallas as pl
from jax.experimental.pallas import tpu as pltpu


# --------------------------- fused decoder kernel ---------------------------
def _decoder_kernel(z_ref, w1_ref, b1_ref, w2_ref, b2_ref,
                    m1_ref, c1_ref, m2_ref, c2_ref, o_ref, *, compute_dtype):
    def mm(a, w_ref):
        # Weights are already stored in compute_dtype (bf16 by default): no
        # per-step weight cast; f32 accumulation on the MXU.
        return jnp.dot(a.astype(compute_dtype), w_ref[...],
                       preferred_element_type=jnp.float32)

    h = jnp.maximum(mm(z_ref[...], w1_ref) + b1_ref[...], 0.0)   # (bt, 1024)
    h = jnp.maximum(mm(h, w2_ref) + b2_ref[...], 0.0)            # (bt, d2)
    h = jnp.maximum(mm(h, m1_ref) + c1_ref[...], 0.0)            # (bt, nf*Ho1*Wo1)
    o_ref[...] = jax.nn.sigmoid(mm(h, m2_ref) + c2_ref[...])     # (bt, nc*Ho2*Wo2)


# ------------------- ConvTranspose2d -> dense matrix (prep) -----------------
def _convt_matrix(w_torch, H, W, stride=2, padding=1):
    """Unroll torch ConvTranspose2d weight (Cin,Cout,K,K) into a dense matrix
    mapping flattened NCHW input (Cin*H*W) -> flattened NCHW output
    (Cout*Ho*Wo): y[:, iy*s-p+ky, ix*s-p+kx] += x[:, iy, ix] @ w[:, :, ky, kx]."""
    w = np.asarray(w_torch, np.float32)
    Cin, Cout, K, _ = w.shape
    Ho = (H - 1) * stride - 2 * padding + K
    Wo = (W - 1) * stride - 2 * padding + K
    M = np.zeros((Cin, H, W, Cout, Ho, Wo), np.float32)
    for iy in range(H):
        for ky in range(K):
            oy = iy * stride - padding + ky
            if not (0 <= oy < Ho):
                continue
            for ix in range(W):
                for kx in range(K):
                    ox = ix * stride - padding + kx
                    if not (0 <= ox < Wo):
                        continue
                    M[:, iy, ix, :, oy, ox] += w[:, :, ky, kx]
    return M.reshape(Cin * H * W, Cout * Ho * Wo), Ho, Wo


def prepare_decoder_params(p, *, n_filters, after_conv, nc,
                           weight_dtype=jnp.bfloat16):
    """One-time prep: unroll both deconvs to dense matrices, pre-broadcast
    their biases over spatial positions, store matmul weights in weight_dtype
    (bf16 by default; biases stay f32 and are added post-accumulation)."""
    M1, Ho1, Wo1 = _convt_matrix(p["wd1"], after_conv, after_conv)
    M2, Ho2, Wo2 = _convt_matrix(p["wd2"], Ho1, Wo1)
    c1 = np.repeat(np.asarray(p["bd1"], np.float32), Ho1 * Wo1)[None, :]
    c2 = np.repeat(np.asarray(p["bd2"], np.float32), Ho2 * Wo2)[None, :]
    return {
        "w1": jnp.asarray(p["w1"], weight_dtype),
        "b1": jnp.asarray(p["b1"], jnp.float32).reshape(1, -1),
        "w2": jnp.asarray(p["w2"], weight_dtype),
        "b2": jnp.asarray(p["b2"], jnp.float32).reshape(1, -1),
        "m1": jnp.asarray(M1, weight_dtype), "c1": jnp.asarray(c1),
        "m2": jnp.asarray(M2, weight_dtype), "c2": jnp.asarray(c2),
        "nc": nc, "out_hw": (Ho2, Wo2),
    }


# --------------------------- tiling / budget helpers -------------------------
_SUB = 8  # f32 sublane count; z/out live in VMEM as f32


def _batch_block(B, batch_block):
    bt = min(batch_block, B)
    if bt < B:
        bt = -(-bt // _SUB) * _SUB          # interior blocks must be 8-aligned
        if bt >= B:
            bt = B
    elif B >= 2 * _SUB:
        # Give the "parallel" axis >= 2 grid steps so both v7x TensorCores work.
        bt = -(-(-(-B // 2)) // _SUB) * _SUB  # round_up(ceil(B/2), 8)
    return bt


def _invariant_spec(arr):
    """Whole-array, block-invariant weight: single-buffered (its index_map
    never changes, so double-buffering would only double resident VMEM)."""
    idx = lambda i: (0,) * arr.ndim
    try:
        return pl.BlockSpec(arr.shape, idx, pipeline_mode=pl.Buffered(1))
    except TypeError:  # older BlockSpec without pipeline_mode
        return pl.BlockSpec(arr.shape, idx)


def _budget_and_cost(pp, weights, B, bt, z_dim, out_dim):
    d1 = pp["w1"].shape[1]
    d2 = pp["w2"].shape[1]
    n1 = pp["m1"].shape[1]
    w_bytes = sum(int(np.prod(w.shape)) * w.dtype.itemsize for w in weights)
    io_bytes = 2 * bt * (z_dim + out_dim) * 4            # double-buffered z / out
    act_bytes = 2 * bt * (d1 + d2 + n1 + out_dim) * 4    # f32 accums + cast copies
    vmem_limit = int(min(max(2 * (w_bytes + io_bytes + act_bytes), 32 << 20),
                         56 << 20))
    cost = pl.CostEstimate(
        flops=2 * B * (z_dim * d1 + d1 * d2 + d2 * n1 + n1 * out_dim),
        transcendentals=B * out_dim,                      # sigmoid
        bytes_accessed=w_bytes + (B * z_dim + B * out_dim) * 4)
    return vmem_limit, cost


# ------------------------------- forward ------------------------------------
def decoder_forward(z, pp, *, batch_block=256, compute_dtype=None):
    B, z_dim = z.shape
    out_dim = pp["m2"].shape[1]
    if compute_dtype is None:
        compute_dtype = pp["w1"].dtype

    bt = _batch_block(B, batch_block)
    grid = (pl.cdiv(B, bt),)

    weights = (pp["w1"], pp["b1"], pp["w2"], pp["b2"],
               pp["m1"], pp["c1"], pp["m2"], pp["c2"])
    in_specs = [pl.BlockSpec((bt, z_dim), lambda i: (i, 0))]
    in_specs += [_invariant_spec(w) for w in weights]
    out_spec = pl.BlockSpec((bt, out_dim), lambda i: (i, 0))

    vmem_limit, cost = _budget_and_cost(pp, weights, B, bt, z_dim, out_dim)

    kernel = functools.partial(_decoder_kernel, compute_dtype=compute_dtype)
    y = pl.pallas_call(
        kernel,
        out_shape=jax.ShapeDtypeStruct((B, out_dim), jnp.float32),
        grid=grid,
        in_specs=in_specs,
        out_specs=out_spec,
        cost_estimate=cost,
        compiler_params=pltpu.CompilerParams(
            dimension_semantics=("parallel",),
            vmem_limit_bytes=vmem_limit),
    )(z, *weights)

    Ho, Wo = pp["out_hw"]
    return y.reshape(B, pp["nc"], Ho, Wo)     # flat NCHW order -> NCHW view


# ------------------------------ parameters -----------------------------------
def init_params(key, z_dim, nc, n_filters, after_conv):
    ks = jax.random.split(key, 8)
    d2 = after_conv * after_conv * 2 * n_filters
    p = {}
    p["w1"] = jax.random.normal(ks[0], (z_dim, 1024), jnp.float32) * 0.05
    p["b1"] = jax.random.normal(ks[1], (1, 1024), jnp.float32) * 0.01
    p["w2"] = jax.random.normal(ks[2], (1024, d2), jnp.float32) * 0.05
    p["b2"] = jax.random.normal(ks[3], (1, d2), jnp.float32) * 0.01
    # ConvTranspose2d weights in torch layout: (in_ch, out_ch, kH, kW)
    p["wd1"] = jax.random.normal(ks[4], (2 * n_filters, n_filters, 4, 4),
                                 jnp.float32) * 0.05
    p["bd1"] = jax.random.normal(ks[5], (n_filters,), jnp.float32) * 0.01
    p["wd2"] = jax.random.normal(ks[6], (n_filters, nc, 4, 4),
                                 jnp.float32) * 0.05
    p["bd2"] = jax.random.normal(ks[7], (nc,), jnp.float32) * 0.01
    return p


# Pure-JAX reference (same math, via XLA conv) for a correctness cross-check.
def _ref_forward(z, p, n_filters, after_conv, nc):
    h = jnp.maximum(z @ p["w1"] + p["b1"], 0.0)
    h = jnp.maximum(h @ p["w2"] + p["b2"], 0.0)
    B = z.shape[0]
    x = h.reshape(B, 2 * n_filters, after_conv, after_conv)

    def convt(x, w, b):
        w_oihw = jnp.transpose(w[:, :, ::-1, ::-1], (1, 0, 2, 3))
        y = jax.lax.conv_general_dilated(
            x, w_oihw, window_strides=(1, 1), padding=[(2, 2), (2, 2)],
            lhs_dilation=(2, 2), dimension_numbers=("NCHW", "OIHW", "NCHW"))
        return y + b.reshape(1, -1, 1, 1)

    x = jnp.maximum(convt(x, p["wd1"], p["bd1"]), 0.0)
    return jax.nn.sigmoid(convt(x, p["wd2"], p["bd2"]))


if __name__ == "__main__":
    z_dim, nc, n_filters, after_conv = 8, 3, 4, 4
    key = jax.random.PRNGKey(0)
    kz, kz2, kp = jax.random.split(key, 3)
    params = init_params(kp, z_dim, nc, n_filters, after_conv)
    prepped = prepare_decoder_params(params, n_filters=n_filters,
                                     after_conv=after_conv, nc=nc)
    # bf16 weight storage -> dtype-dependent tolerance vs. the f32 reference.
    tol = 3e-2 if prepped["w1"].dtype == jnp.bfloat16 else 1e-4

    # Case 1: toy batch (single block).
    B = 2
    z = jax.random.normal(kz, (B, z_dim), jnp.float32)
    out = jax.block_until_ready(decoder_forward(z, prepped))
    assert out.shape == (B, nc, after_conv * 4, after_conv * 4), out.shape
    ref = _ref_forward(z, params, n_filters, after_conv, nc)
    assert jnp.allclose(out, ref, atol=tol, rtol=tol), \
        float(jnp.max(jnp.abs(out - ref)))

    # Case 2: B not a multiple of the batch block (multi-step grid, padded
    # last block + masked output writeback).
    B2 = 10
    z2 = jax.random.normal(kz2, (B2, z_dim), jnp.float32)
    out2 = jax.block_until_ready(decoder_forward(z2, prepped, batch_block=8))
    ref2 = _ref_forward(z2, params, n_filters, after_conv, nc)
    assert out2.shape == ref2.shape, out2.shape
    assert jnp.allclose(out2, ref2, atol=tol, rtol=tol), \
        float(jnp.max(jnp.abs(out2 - ref2)))

    print("KERNEL_OK")
</pallas_src>

<mosaic_0001>
module attributes {stable_mosaic.version = 11 : i64} {
  func.func @_decoder_kernel(%arg0: i32, %arg1: memref<2x8xf32, #tpu.memory_space<vmem>>, %arg2: memref<8x1024xbf16, #tpu.memory_space<vmem>>, %arg3: memref<1x1024xf32, #tpu.memory_space<vmem>>, %arg4: memref<1024x128xbf16, #tpu.memory_space<vmem>>, %arg5: memref<1x128xf32, #tpu.memory_space<vmem>>, %arg6: memref<128x256xbf16, #tpu.memory_space<vmem>>, %arg7: memref<1x256xf32, #tpu.memory_space<vmem>>, %arg8: memref<256x768xbf16, #tpu.memory_space<vmem>>, %arg9: memref<1x768xf32, #tpu.memory_space<vmem>>, %arg10: memref<2x768xf32, #tpu.memory_space<vmem>>) attributes {dimension_semantics = [#tpu.dimension_semantics<parallel>], iteration_bounds = array<i64: 1>, scalar_prefetch = 0 : i64, scratch_operands = 0 : i64, tpu.core_type = #tpu.core_type<tc>, window_params = [{transform_indices = @transform_0, window_bounds = array<i64: 2, 8>}, {pipeline_mode = #tpu.pipeline_mode<synchronous>, transform_indices = @transform_1, window_bounds = array<i64: 8, 1024>}, {pipeline_mode = #tpu.pipeline_mode<synchronous>, transform_indices = @transform_2, window_bounds = array<i64: 1, 1024>}, {pipeline_mode = #tpu.pipeline_mode<synchronous>, transform_indices = @transform_3, window_bounds = array<i64: 1024, 128>}, {pipeline_mode = #tpu.pipeline_mode<synchronous>, transform_indices = @transform_4, window_bounds = array<i64: 1, 128>}, {pipeline_mode = #tpu.pipeline_mode<synchronous>, transform_indices = @transform_5, window_bounds = array<i64: 128, 256>}, {pipeline_mode = #tpu.pipeline_mode<synchronous>, transform_indices = @transform_6, window_bounds = array<i64: 1, 256>}, {pipeline_mode = #tpu.pipeline_mode<synchronous>, transform_indices = @transform_7, window_bounds = array<i64: 256, 768>}, {pipeline_mode = #tpu.pipeline_mode<synchronous>, transform_indices = @transform_8, window_bounds = array<i64: 1, 768>}, {transform_indices = @transform_9, window_bounds = array<i64: 2, 768>}]} {
    %c0 = arith.constant 0 : index
    %c0_0 = arith.constant 0 : index
    %0 = vector.load %arg1[%c0, %c0_0] : memref<2x8xf32, #tpu.memory_space<vmem>>, vector<2x8xf32>
    %1 = arith.truncf %0 : vector<2x8xf32> to vector<2x8xbf16>
    %c0_1 = arith.constant 0 : index
    %c0_2 = arith.constant 0 : index
    %2 = vector.load %arg2[%c0_1, %c0_2] : memref<8x1024xbf16, #tpu.memory_space<vmem>>, vector<8x1024xbf16>
    %cst = arith.constant dense<0.000000e+00> : vector<2x1024xf32>
    %3 = tpu.matmul %1, %2, %cst {dimension_numbers = #tpu.dot_dimension_numbers<[1], [0], [0], [1], [0, 0, 1, 1], [], []>} : vector<2x8xbf16>, vector<8x1024xbf16>, vector<2x1024xf32> -> vector<2x1024xf32>
    %c0_3 = arith.constant 0 : index
    %c0_4 = arith.constant 0 : index
    %4 = vector.load %arg3[%c0_3, %c0_4] : memref<1x1024xf32, #tpu.memory_space<vmem>>, vector<1x1024xf32>
    %5 = vector.broadcast %4 : vector<1x1024xf32> to vector<2x1024xf32>
    %6 = arith.addf %3, %5 : vector<2x1024xf32>
    %cst_5 = arith.constant 0.000000e+00 : f32
    %7 = vector.broadcast %cst_5 : f32 to vector<2x1024xf32>
    %8 = arith.maximumf %6, %7 : vector<2x1024xf32>
    %9 = arith.truncf %8 : vector<2x1024xf32> to vector<2x1024xbf16>
    %c0_6 = arith.constant 0 : index
    %c0_7 = arith.constant 0 : index
    %10 = vector.load %arg4[%c0_6, %c0_7] : memref<1024x128xbf16, #tpu.memory_space<vmem>>, vector<1024x128xbf16>
    %cst_8 = arith.constant dense<0.000000e+00> : vector<2x128xf32>
    %11 = tpu.matmul %9, %10, %cst_8 {dimension_numbers = #tpu.dot_dimension_numbers<[1], [0], [0], [1], [0, 0, 1, 1], [], []>} : vector<2x1024xbf16>, vector<1024x128xbf16>, vector<2x128xf32> -> vector<2x128xf32>
    %c0_9 = arith.constant 0 : index
    %c0_10 = arith.constant 0 : index
    %12 = vector.load %arg5[%c0_9, %c0_10] : memref<1x128xf32, #tpu.memory_space<vmem>>, vector<1x128xf32>
    %13 = vector.broadcast %12 : vector<1x128xf32> to vector<2x128xf32>
    %14 = arith.addf %11, %13 : vector<2x128xf32>
    %cst_11 = arith.constant 0.000000e+00 : f32
    %15 = vector.broadcast %cst_11 : f32 to vector<2x128xf32>
    %16 = arith.maximumf %14, %15 : vector<2x128xf32>
    %17 = arith.truncf %16 : vector<2x128xf32> to vector<2x128xbf16>
    %c0_12 = arith.constant 0 : index
    %c0_13 = arith.constant 0 : index
    %18 = vector.load %arg6[%c0_12, %c0_13] : memref<128x256xbf16, #tpu.memory_space<vmem>>, vector<128x256xbf16>
    %cst_14 = arith.constant dense<0.000000e+00> : vector<2x256xf32>
    %19 = tpu.matmul %17, %18, %cst_14 {dimension_numbers = #tpu.dot_dimension_numbers<[1], [0], [0], [1], [0, 0, 1, 1], [], []>} : vector<2x128xbf16>, vector<128x256xbf16>, vector<2x256xf32> -> vector<2x256xf32>
    %c0_15 = arith.constant 0 : index
    %c0_16 = arith.constant 0 : index
    %20 = vector.load %arg7[%c0_15, %c0_16] : memref<1x256xf32, #tpu.memory_space<vmem>>, vector<1x256xf32>
    %21 = vector.broadcast %20 : vector<1x256xf32> to vector<2x256xf32>
    %22 = arith.addf %19, %21 : vector<2x256xf32>
    %cst_17 = arith.constant 0.000000e+00 : f32
    %23 = vector.broadcast %cst_17 : f32 to vector<2x256xf32>
    %24 = arith.maximumf %22, %23 : vector<2x256xf32>
    %25 = arith.truncf %24 : vector<2x256xf32> to vector<2x256xbf16>
    %c0_18 = arith.constant 0 : index
    %c0_19 = arith.constant 0 : index
    %26 = vector.load %arg8[%c0_18, %c0_19] : memref<256x768xbf16, #tpu.memory_space<vmem>>, vector<256x768xbf16>
    %cst_20 = arith.constant dense<0.000000e+00> : vector<2x768xf32>
    %27 = tpu.matmul %25, %26, %cst_20 {dimension_numbers = #tpu.dot_dimension_numbers<[1], [0], [0], [1], [0, 0, 1, 1], [], []>} : vector<2x256xbf16>, vector<256x768xbf16>, vector<2x768xf32> -> vector<2x768xf32>
    %c0_21 = arith.constant 0 : index
    %c0_22 = arith.constant 0 : index
    %28 = vector.load %arg9[%c0_21, %c0_22] : memref<1x768xf32, #tpu.memory_space<vmem>>, vector<1x768xf32>
    %29 = vector.broadcast %28 : vector<1x768xf32> to vector<2x768xf32>
    %30 = arith.addf %27, %29 : vector<2x768xf32>
    %31 = arith.negf %30 : vector<2x768xf32>
    %32 = math.exp %31 : vector<2x768xf32>
    %cst_23 = arith.constant 1.000000e+00 : f32
    %33 = vector.broadcast %cst_23 : f32 to vector<2x768xf32>
    %34 = arith.addf %33, %32 : vector<2x768xf32>
    %35 = arith.divf %33, %34 : vector<2x768xf32>
    %c0_24 = arith.constant 0 : index
    %c0_25 = arith.constant 0 : index
    %36 = vector.load %arg10[%c0_24, %c0_25] : memref<2x768xf32, #tpu.memory_space<vmem>>, vector<2x768xf32>
    tpu.vector_store %arg10[%c0_24, %c0_25], %35 {strides = array<i32>} : memref<2x768xf32, #tpu.memory_space<vmem>>, vector<2x768xf32>,
    return
  }
  func.func @transform_0(%arg0: i32) -> (i32, i32) {
    %c0_i32 = arith.constant 0 : i32
    %c0_i32_0 = arith.constant 0 : i32
    return %arg0, %c0_i32 : i32, i32
  }
  func.func @transform_1(%arg0: i32) -> (i32, i32) {
    %c0_i32 = arith.constant 0 : i32
    %c0_i32_0 = arith.constant 0 : i32
    %c0_i32_1 = arith.constant 0 : i32
    return %c0_i32, %c0_i32_0 : i32, i32
  }
  func.func @transform_2(%arg0: i32) -> (i32, i32) {
    %c0_i32 = arith.constant 0 : i32
    %c0_i32_0 = arith.constant 0 : i32
    %c0_i32_1 = arith.constant 0 : i32
    return %c0_i32, %c0_i32_0 : i32, i32
  }
  func.func @transform_3(%arg0: i32) -> (i32, i32) {
    %c0_i32 = arith.constant 0 : i32
    %c0_i32_0 = arith.constant 0 : i32
    %c0_i32_1 = arith.constant 0 : i32
    return %c0_i32, %c0_i32_0 : i32, i32
  }
  func.func @transform_4(%arg0: i32) -> (i32, i32) {
    %c0_i32 = arith.constant 0 : i32
    %c0_i32_0 = arith.constant 0 : i32
    %c0_i32_1 = arith.constant 0 : i32
    return %c0_i32, %c0_i32_0 : i32, i32
  }
  func.func @transform_5(%arg0: i32) -> (i32, i32) {
    %c0_i32 = arith.constant 0 : i32
    %c0_i32_0 = arith.constant 0 : i32
    %c0_i32_1 = arith.constant 0 : i32
    return %c0_i32, %c0_i32_0 : i32, i32
  }
  func.func @transform_6(%arg0: i32) -> (i32, i32) {
    %c0_i32 = arith.constant 0 : i32
    %c0_i32_0 = arith.constant 0 : i32
    %c0_i32_1 = arith.constant 0 : i32
    return %c0_i32, %c0_i32_0 : i32, i32
  }
  func.func @transform_7(%arg0: i32) -> (i32, i32) {
    %c0_i32 = arith.constant 0 : i32
    %c0_i32_0 = arith.constant 0 : i32
    %c0_i32_1 = arith.constant 0 : i32
    return %c0_i32, %c0_i32_0 : i32, i32
  }
  func.func @transform_8(%arg0: i32) -> (i32, i32) {
    %c0_i32 = arith.constant 0 : i32
    %c0_i32_0 = arith.constant 0 : i32
    %c0_i32_1 = arith.constant 0 : i32
    return %c0_i32, %c0_i32_0 : i32, i32
  }
  func.func @transform_9(%arg0: i32) -> (i32, i32) {
    %c0_i32 = arith.constant 0 : i32
    %c0_i32_0 = arith.constant 0 : i32
    return %arg0, %c0_i32 : i32, i32
  }
}

</mosaic_0001>

<bundles_post_ra>
// kernel: tpu_custom_call.1
= control target key start
LH: loop header
LB: loop body
LE: loop exit
PB: predicated region body
PF: predicated region fallthrough
CT: control target
= control target key end

     0   :  { %14 = vsyncpa [#allocation3], 0  ;;  %s3006_s0 = inlined_call_operand.hbm [shape: f32[2,8], index: 0, kind: input, shape index: {}]   ;;  %s3007_s1 = inlined_call_operand.hbm [shape: bf16[8,1024], index: 1, kind: input, shape index: {}]   ;;  %s3008_s2 = inlined_call_operand.hbm [shape: f32[1,1024], index: 2, kind: input, shape index: {}]   ;;  %s3009_s3 = inlined_call_operand.hbm [shape: bf16[1024,128], index: 3, kind: input, shape index: {}]   ;;  %s3010_s4 = inlined_call_operand.vmem [shape: f32[1,128], index: 4, kind: input, shape index: {}]   ;;  %s3011_s5 = inlined_call_operand.hbm [shape: bf16[128,256], index: 5, kind: input, shape index: {}]   ;;  %s3012_s6 = inlined_call_operand.vmem [shape: f32[1,256], index: 6, kind: input, shape index: {}]   ;;  %s3013_s7 = inlined_call_operand.hbm [shape: bf16[256,768], index: 7, kind: input, shape index: {}]   ;;  %s3014_s8 = inlined_call_operand.vmem [shape: f32[1,768], index: 8, kind: input, shape index: {}]   ;;  %s3015_s9 = inlined_call_operand.hbm [shape: f32[2,768], index: 9, kind: output, shape index: {}]  }
   0x1   :  { %15 = vsyncpa [#allocation6], 0 }
   0x2   :  { %16 = vsyncpa [#allocation9], 0 }
   0x3   :  { %17 = vsyncpa [#allocation12], 0 }
   0x4   :  { %18 = vsyncpa [#allocation4], 0  ;;  %s2772_s30 = smov [#allocation5]   ;;  %s2773_s11 = smov [#allocation8]  }
   0x5   :  { %s35_s10 = sshll.u32 %s2772_s30, 4  ;;  %s54_s12 = sshll.u32 %s2773_s11, 4  ;;  %s36_s10 = int_to_ptr.vmem [resolvable:$true] %s35_s10  ;;  %s2837_s12 = int_to_ptr.vmem [resolvable:$true] %s54_s12 }
   0x6   :  { %s2608_s15 = scalar_lea.hbm %s3007_s1, 512 }
   0x7   :  { %p2609_p0 = scmp.ne.s32.totalorder %s3007_s1, %s2608_s15  ;;  %p2612_p1 = scmp.lt.u32.totalorder %s2608_s15, %s3007_s1 }
   0x9   :  { %p2614_p2 = pnand %p2612_p1, %p2609_p0 }
   0xb   :  { %2617 = shalt.err (!%p2614_p2)
}
   0xc   :  { %s2618_s20 = scalar_lea.vmem %s36_s10, 512  ;;  %p2623_p4 = scmp.lt.s32.totalorder %s36_s10, %s36_s10 }
   0xd   :  { %p2619_p3 = scmp.ne.s32.totalorder %s36_s10, %s2618_s20  ;;  %p2624_p5 = scmp.lt.s32.totalorder %s2618_s20, %s2618_s20 }
   0xf   :  { %p2625_p6 = por %p2624_p5, %p2623_p4 }
  0x11   :  { %p2626_p7 = pnand %p2625_p6, %p2619_p3 }
  0x13   :  { %2629 = shalt.err (!%p2626_p7)
}
  0x14   :  { %38 = dma.hbm_to_vmem [thread:$0]  %s3007_s1, 512, %s36_s10, [#allocation6]  }
  0x15   :  { %s2630_s25 = scalar_lea.hbm %s3009_s3, 8192 }
  0x16   :  { %p2631_p8 = scmp.ne.s32.totalorder %s3009_s3, %s2630_s25  ;;  %p2634_p9 = scmp.lt.u32.totalorder %s2630_s25, %s3009_s3 }
  0x18   :  { %p2636_p10 = pnand %p2634_p9, %p2631_p8 }
  0x1a   :  { %2639 = shalt.err (!%p2636_p10)
}
  0x1b   :  { %s2640_s30 = scalar_lea.vmem %s2837_s12, 8192  ;;  %p2645_p12 = scmp.lt.s32.totalorder %s2837_s12, %s2837_s12 }
  0x1c   :  { %p2641_p11 = scmp.ne.s32.totalorder %s2837_s12, %s2640_s30  ;;  %p2646_p13 = scmp.lt.s32.totalorder %s2640_s30, %s2640_s30 }
  0x1e   :  { %p2647_p0 = por %p2646_p13, %p2645_p12 }
  0x20   :  { %p2648_p1 = pnand %p2647_p0, %p2641_p11 }
  0x22   :  { %2651 = shalt.err (!%p2648_p1)
}
  0x23   :  { %s2774_s1 = smov 64   ;;  %s2775_s10 = smov 4  }
  0x24   :  { %60 = dma.hbm_to_vmem [thread:$0]  %s3009_s3, 8192, %s2837_s12, [#allocation9], %s2774_s1, %s2774_s1, %s2775_s10  }
  0x25   :  { %s2776_s14 = smov [#allocation2]   ;;  %s2777_s16 = smov [#allocation7]  }
  0x26   :  { %s25_s15 = sshll.u32 %s2776_s14, 4  ;;  %s45_s17 = sshll.u32 %s2777_s16, 4  ;;  %s26_s15 = int_to_ptr.vmem [resolvable:$true] %s25_s15  ;;  %s46_s17 = int_to_ptr.vmem [resolvable:$true] %s45_s17 }
  0x27   :  { %s2652_s20 = scalar_lea.hbm %s3006_s0, 32 }
  0x28   :  { %p2653_p2 = scmp.ne.s32.totalorder %s3006_s0, %s2652_s20  ;;  %p2656_p3 = scmp.lt.u32.totalorder %s2652_s20, %s3006_s0 }
  0x2a   :  { %p2658_p4 = pnand %p2656_p3, %p2653_p2 }
  0x2c   :  { %2661 = shalt.err (!%p2658_p4)
}
  0x2d   :  { %s2662_s3 = scalar_lea.vmem %s26_s15, 32  ;;  %p2667_p6 = scmp.lt.s32.totalorder %s26_s15, %s26_s15 }
  0x2e   :  { %p2663_p5 = scmp.ne.s32.totalorder %s26_s15, %s2662_s3  ;;  %p2668_p7 = scmp.lt.s32.totalorder %s2662_s3, %s2662_s3 }
  0x30   :  { %p2669_p8 = por %p2668_p7, %p2667_p6 }
  0x32   :  { %p2670_p9 = pnand %p2669_p8, %p2663_p5 }
  0x34   :  { %2673 = shalt.err (!%p2670_p9)
}
  0x35   :  { %28 = dma.hbm_to_vmem [thread:$0]  %s3006_s0, 32, %s26_s15, [#allocation3]  }
  0x36   :  { %s2674_s28 = scalar_lea.hbm %s3008_s2, 128 }
  0x37   :  { %p2675_p10 = scmp.ne.s32.totalorder %s3008_s2, %s2674_s28  ;;  %p2678_p11 = scmp.lt.u32.totalorder %s2674_s28, %s3008_s2 }
  0x39   :  { %p2680_p12 = pnand %p2678_p11, %p2675_p10 }
  0x3b   :  { %2683 = shalt.err (!%p2680_p12)
}
  0x3c   :  { %s2684_s11 = scalar_lea.vmem %s46_s17, 128  ;;  %p2689_p0 = scmp.lt.s32.totalorder %s46_s17, %s46_s17 }
  0x3d   :  { %p2685_p13 = scmp.ne.s32.totalorder %s46_s17, %s2684_s11  ;;  %p2690_p1 = scmp.lt.s32.totalorder %s2684_s11, %s2684_s11 }
  0x3f   :  { %p2691_p2 = por %p2690_p1, %p2689_p0 }
  0x41   :  { %p2692_p3 = pnand %p2691_p2, %p2685_p13 }
  0x43   :  { %2695 = shalt.err (!%p2692_p3)
}
  0x44   :  { %48 = dma.hbm_to_vmem [thread:$0]  %s3008_s2, 128, %s46_s17, [#allocation6]  }
  0x45   :  { %s2778_s14 = smov [#allocation10]   ;;  %s2696_s19 = scalar_lea.hbm %s3011_s5, 2048 }
  0x46   :  { %s68_s15 = sshll.u32 %s2778_s14, 4  ;;  %p2697_p4 = scmp.ne.s32.totalorder %s3011_s5, %s2696_s19  ;;  %s69_s15 = int_to_ptr.vmem [resolvable:$true] %s68_s15 }
  0x47   :  { %p2700_p5 = scmp.lt.u32.totalorder %s2696_s19, %s3011_s5 }
  0x49   :  { %p2702_p6 = pnand %p2700_p5, %p2697_p4 }
  0x4b   :  { %2705 = shalt.err (!%p2702_p6)
}
  0x4c   :  { %s2706_s24 = scalar_lea.vmem %s69_s15, 2048  ;;  %p2711_p8 = scmp.lt.s32.totalorder %s69_s15, %s69_s15 }
  0x4d   :  { %p2707_p7 = scmp.ne.s32.totalorder %s69_s15, %s2706_s24  ;;  %p2712_p9 = scmp.lt.s32.totalorder %s2706_s24, %s2706_s24 }
  0x4f   :  { %p2713_p10 = por %p2712_p9, %p2711_p8 }
  0x51   :  { %p2714_p11 = pnand %p2713_p10, %p2707_p7 }
  0x53   :  { %2717 = shalt.err (!%p2714_p11)
}
  0x54   :  { %s2779_s2 = smov 128   ;;  %s2780_s17 = smov 8  }
  0x55   :  { %74 = dma.hbm_to_vmem [thread:$0]  %s3011_s5, 2048, %s69_s15, [#allocation9], %s2779_s2, %s2779_s2, %s2780_s17  }
  0x56   :  { %s2781_s25 = smov [#allocation11]   ;;  %s2718_s29 = scalar_lea.hbm %s3013_s7, 12288 }
  0x57   :  { %s82_s26 = sshll.u32 %s2781_s25, 4  ;;  %p2719_p12 = scmp.ne.s32.totalorder %s3013_s7, %s2718_s29  ;;  %s83_s26 = int_to_ptr.vmem [resolvable:$true] %s82_s26 }
  0x58   :  { %p2722_p13 = scmp.lt.u32.totalorder %s2718_s29, %s3013_s7 }
  0x5a   :  { %p2724_p0 = pnand %p2722_p13, %p2719_p12 }
  0x5c   :  { %2727 = shalt.err (!%p2724_p0)
}
  0x5d   :  { %s2728_s0 = scalar_lea.vmem %s83_s26, 12288  ;;  %p2733_p2 = scmp.lt.s32.totalorder %s83_s26, %s83_s26 }
  0x5e   :  { %p2729_p1 = scmp.ne.s32.totalorder %s83_s26, %s2728_s0  ;;  %p2734_p3 = scmp.lt.s32.totalorder %s2728_s0, %s2728_s0 }
  0x60   :  { %p2735_p4 = por %p2734_p3, %p2733_p2 }
  0x62   :  { %p2736_p5 = pnand %p2735_p4, %p2729_p1 }
  0x64   :  { %2739 = shalt.err (!%p2736_p5)
}
  0x65   :  { %s2782_s5 = smov 384   ;;  %s2783_s13 = smov 24  }
  0x66   :  { %88 = dma.hbm_to_vmem [thread:$0]  %s3013_s7, 12288, %s83_s26, [#allocation12], %s2782_s5, %s2782_s5, %s2783_s13  }
  0x67   :  { %2762 = dma.done.wait [#allocation3], 32  }
  0x68   :  { %2763 = vsyncadd [#allocation3], 4294967264 }
  0x69   :  { %2764 = dma.done.wait [#allocation6], 640  }
  0x6a   :  { %2765 = vsyncadd [#allocation6], 4294966656 }
  0x6b   :  { %2766 = dma.done.wait [#allocation9], 10240  }
  0x6c   :  { %2767 = vsyncadd [#allocation9], 4294957056 }
  0x6d   :  { %2768 = dma.done.wait [#allocation12], 12288  }
  0x6e   :  { %2769 = vsyncadd [#allocation12], 4294955008  ;;  %v2784_v0 = vmov 0   ;;  %v112_v1 = vld [vmem:[#allocation5] sm:$0xff]  ;;  %vm182_vm0 = vcmask 1043456   ;;  %v113_v3 = vld [vmem:[#allocation5 + $0x8] sm:$0xff]  ;;  %v118_v53 = vlaneseq }
  0x6f   :  { %239 = vmatprep.mubr.bf16.mxu0 %v2784_v0  ;;  %v110_v2 = vld [vmem:[#allocation2] sm:$0x3]  ;;  %v2042_v4 = vcombine.high %v112_v1, %v112_v1  ;;  %v2041_v5 = vcombine.low %v112_v1, %v112_v1  ;;  %v2044_v6 = vcombine.high %v113_v3, %v113_v3  ;;  %v2043_v7 = vcombine.low %v113_v3, %v113_v3  ;;  %v114_v8 = vld [vmem:[#allocation5 + $0x10] sm:$0xff]  ;;  %v2357_v13 = vld [vmem:[#allocation8 + $0xc0] sm:$0xff]  }
  0x70   :  { %v111_v10 = vpack.c.bf16 %v110_v2, %v110_v2  ;;  %vm178_vm1 = vcmask 64512   ;;  %v2046_v12 = vcombine.high %v114_v8, %v114_v8  ;;  %v2045_v14 = vcombine.low %v114_v8, %v114_v8  ;;  %2263 = vmatprep.subr.bf16.mxu1 %v2357_v13  ;;  %v2359_v15 = vld [vmem:[#allocation8 + $0x80] sm:$0xff]   ;;  %v115_v16 = vld [vmem:[#allocation5 + $0x18] sm:$0xff]  ;;  %v2361_v17 = vld [vmem:[#allocation8 + $0xc8] sm:$0xff]  }
  0x71   :  { %2049 = vmatprep.subr.msk.bf16.mxu0 %vm182_vm0, %v2042_v4  ;;  %v184_v9 = vsel %vm182_vm0, %v2041_v5, 0  ;;  %v190_v11 = vsel %vm182_vm0, %v2043_v7, 0  ;;  %2264 = vmatpush3.bf16.msra.mxu1 %v2359_v15  ;;  %v2048_v19 = vcombine.high %v115_v16, %v115_v16  ;;  %v2363_v20 = vld [vmem:[#allocation8 + $0x88] sm:$0xff]   ;;  %v2365_v21 = vld [vmem:[#allocation8 + $0xd0] sm:$0xff]   ;;  %v2047_v22 = vcombine.low %v115_v16, %v115_v16  ;;  %v2369_v24 = vld [vmem:[#allocation8 + $0xd8] sm:$0xff]  }
  0x72   :  { %208 = vmatpush1.bf16.msra.mxu0 %v184_v9  ;;  %v196_v18 = vsel %vm182_vm0, %v2045_v14, 0  ;;  %2265 = vmatprep.subr.bf16.mxu1 %v2361_v17  ;;  %v2367_v23 = vld [vmem:[#allocation8 + $0x90] sm:$0xff]   ;;  %v2352_v26 = vld [vmem:[#allocation8 + $0x40] sm:$0xff]   ;;  %v2371_v27 = vld [vmem:[#allocation8 + $0x98] sm:$0xff]   ;;  %v2932_v54 = vshrl.u32 %v118_v53, 7 }
  0x73   :  { %2051 = vmatprep.subr.msk.bf16.mxu0 %vm182_vm0, %v2044_v6  ;;  %v202_v25 = vsel %vm182_vm0, %v2047_v22, 0  ;;  %v2353_v28 = vld [vmem:[#allocation8] sm:$0xff]   ;;  %v2354_v29 = vld [vmem:[#allocation8 + $0x48] sm:$0xff]   ;;  %v2356_v31 = vld [vmem:[#allocation8 + $0x50] sm:$0xff]  }
  0x74   :  { %v2355_v30 = vld [vmem:[#allocation8 + $0x8] sm:$0xff]   ;;  %v2358_v32 = vld [vmem:[#allocation8 + $0x10] sm:$0xff]   ;;  %v2360_v33 = vld [vmem:[#allocation8 + $0x58] sm:$0xff]   ;;  %v2935_v55 = vsub.s32 0, %v2932_v54  ;;  %v2940_v57 = vsub.s32 1, %v2932_v54  ;;  %v128_v63 = vsub.s32 2, %v2932_v54 }
  0x75   :  { %2050 = vmatmul.mubr.msk.bf16.vlgmr.msra.gmra.mrb[0].mxu0 %vm178_vm1, %v111_v10  ;;  %2266 = vmatpush3.bf16.msra.mxu1 %v2363_v20  ;;  %v2362_v34 = vld [vmem:[#allocation8 + $0x18] sm:$0xff]   ;;  %v2364_v35 = vld [vmem:[#allocation8 + $0x60] sm:$0xff]   ;;  %v2368_v37 = vld [vmem:[#allocation8 + $0x68] sm:$0xff]   ;;  %v132_v3 = vsub.s32 3, %v2932_v54 }
  0x76   :  { %249 = vmatpush1.bf16.msra.mxu0 %v190_v11  ;;  %280 = vmatprep.mubr.bf16.mxu0 %v2784_v0  ;;  %v2366_v36 = vld [vmem:[#allocation8 + $0x20] sm:$0xff]   ;;  %v2370_v38 = vld [vmem:[#allocation8 + $0x28] sm:$0xff]   ;;  %v2372_v39 = vld [vmem:[#allocation8 + $0x70] sm:$0xff]  }
  0x77   :  { %2053 = vmatprep.subr.msk.bf16.mxu0 %vm182_vm0, %v2046_v12  ;;  %2267 = vmatprep.subr.bf16.mxu1 %v2365_v21  ;;  %v2373_v40 = vld [vmem:[#allocation8 + $0xe0] sm:$0xff]   ;;  %v2374_v41 = vld [vmem:[#allocation8 + $0x30] sm:$0xff]   ;;  %v2376_v43 = vld [vmem:[#allocation8 + $0x78] sm:$0xff]  }
  0x78   :  { %v2375_v42 = vld [vmem:[#allocation8 + $0xa0] sm:$0xff]   ;;  %v2377_v44 = vld [vmem:[#allocation8 + $0xe8] sm:$0xff]   ;;  %v2378_v45 = vld [vmem:[#allocation8 + $0x38] sm:$0xff]  }
  0x79   :  { %2268 = vmatpush3.bf16.msra.mxu1 %v2367_v23  ;;  %v2379_v46 = vld [vmem:[#allocation8 + $0xa8] sm:$0xff]   ;;  %v2380_v47 = vld [vmem:[#allocation8 + $0xf0] sm:$0xff]   ;;  %v2381_v48 = vld [vmem:[#allocation8 + $0x140] sm:$0xff]  }
  0x7a   :  { %2269 = vmatprep.subr.bf16.mxu1 %v2369_v24  ;;  %v2382_v49 = vld [vmem:[#allocation8 + $0xb0] sm:$0xff]   ;;  %v2384_v50 = vld [vmem:[#allocation8 + $0xf8] sm:$0xff]   ;;  %v2389_v52 = vld [vmem:[#allocation8 + $0x1c0] sm:$0xff]  }
  0x7b   :  { %v2386_v51 = vld [vmem:[#allocation8 + $0xb8] sm:$0xff]   ;;  %v2385_v12 = vld [vmem:[#allocation8 + $0x148] sm:$0xff]   ;;  %v2388_v22 = vld [vmem:[#allocation8 + $0x150] sm:$0xff]  }
  0x7c   :  { %v2937_v56 = vld [vmem:[#allocation7] sm:$0xff] }
  0x7d   :  { %2052 = vmatmul.mubr.msk.bf16.vlgmr.msra.gmra.mrb[4].mxu0 %vm178_vm1, %v111_v10  ;;  %2270 = vmatpush3.bf16.msra.mxu1 %v2371_v27  ;;  %v121_v58 = vrot.slane %v2937_v56, %v2935_v55  ;;  %v125_v59 = vrot.slane %v2937_v56, %v2940_v57  ;;  %v129_v7 = vrot.slane %v2937_v56, %v128_v63 }
  0x7e   :  { %290 = vmatpush1.bf16.msra.mxu0 %v196_v18  ;;  %321 = vmatprep.mubr.bf16.mxu0 %v2784_v0  ;;  %v133_v9 = vrot.slane %v2937_v56, %v132_v3  ;;  %v2387_v18 = vld [vmem:[#allocation8 + $0x108] sm:$0xff]  }
  0x7f   :  { %2055 = vmatprep.subr.msk.bf16.mxu0 %vm182_vm0, %v2048_v19  ;;  %2271 = vmatprep.subr.bf16.mxu1 %v2373_v40  ;;  %v140_v19 = vsub.s32 5, %v2932_v54 }
  0x81   :  { %2272 = vmatpush3.bf16.msra.mxu1 %v2375_v42  ;;  %v141_v27 = vrot.slane %v2937_v56, %v140_v19  ;;  %v2398_v42 = vld [vmem:[#allocation8 + $0x120] sm:$0xff]  }
  0x82   :  { %2273 = vmatprep.subr.bf16.mxu1 %v2377_v44 }
  0x85   :  { %2054 = vmatmul.mubr.msk.bf16.vlgmr.msra.gmra.mrb[8].mxu0 %vm178_vm1, %v111_v10  ;;  %2274 = vmatpush3.bf16.msra.mxu1 %v2379_v46  ;;  %v2400_v46 = vld [vmem:[#allocation8 + $0x168] sm:$0xff]  }
  0x86   :  { %331 = vmatpush1.bf16.msra.mxu0 %v202_v25  ;;  %362 = vmatprep.mubr.bf16.mxu0 %v2784_v0  ;;  %v2390_v25 = vld [vmem:[#allocation8 + $0x110] sm:$0xff]  }
  0x87   :  { %2241 = vmatprep.subr.bf16.mxu0 %v2352_v26  ;;  %2275 = vmatprep.subr.bf16.mxu1 %v2380_v47  ;;  %v2391_v26 = vld [vmem:[#allocation8 + $0x180] sm:$0xff]   ;;  %v2401_v47 = vld [vmem:[#allocation8 + $0x1d8] sm:$0xff]  }
  0x89   :  { %2276 = vmatpush3.bf16.msra.mxu1 %v2382_v49 }
  0x8a   :  { %2277 = vmatprep.subr.bf16.mxu1 %v2384_v50 }
  0x8d   :  { %2056 = vmatmul.mubr.msk.bf16.vlgmr.msra.gmra.mrb[12].mxu0 %vm178_vm1, %v111_v10  ;;  %2278 = vmatpush3.bf16.msra.mxu1 %v2386_v51  ;;  %v2383_v10 = vld [vmem:[#allocation8 + $0x100] sm:$0xff]   ;;  %v2402_v51 = vld [vmem:[#allocation8 + $0x128] sm:$0xff]  }
  0x8e   :  { %2242 = vmatpush3.bf16.msra.mxu0 %v2353_v28  ;;  %2307 = vmatprep.subr.bf16.mxu1 %v2389_v52  ;;  %v2403_v52 = vld [vmem:[#allocation8 + $0x198] sm:$0xff]  }
  0x8f   :  { %2243 = vmatprep.subr.bf16.mxu0 %v2354_v29  ;;  %v2392_v29 = vld [vmem:[#allocation8 + $0x158] sm:$0xff]  }
  0x92   :  { %2244 = vmatpush3.bf16.msra.mxu0 %v2355_v30  ;;  %v2393_v30 = vld [vmem:[#allocation8 + $0x1c8] sm:$0xff]  }
  0x93   :  { %2245 = vmatprep.subr.bf16.mxu0 %v2356_v31 }
  0x96   :  { %2246 = vmatpush3.bf16.msra.mxu0 %v2358_v32 }
  0x97   :  { %2247 = vmatprep.subr.bf16.mxu0 %v2360_v33  ;;  %v2394_v33 = vld [vmem:[#allocation8 + $0x118] sm:$0xff]  }
  0x9a   :  { %2248 = vmatpush3.bf16.msra.mxu0 %v2362_v34  ;;  %v2395_v34 = vld [vmem:[#allocation8 + $0x188] sm:$0xff]  }
  0x9b   :  { %2249 = vmatprep.subr.bf16.mxu0 %v2364_v35 }
  0x9e   :  { %2250 = vmatpush3.bf16.msra.mxu0 %v2366_v36 }
  0x9f   :  { %2251 = vmatprep.subr.bf16.mxu0 %v2368_v37  ;;  %v148_v37 = vsub.s32 7, %v2932_v54 }
  0xa2   :  { %2252 = vmatpush3.bf16.msra.mxu0 %v2370_v38  ;;  %v2396_v38 = vld [vmem:[#allocation8 + $0x160] sm:$0xff]  }
  0xa3   :  { %2253 = vmatprep.subr.bf16.mxu0 %v2372_v39  ;;  %v2397_v39 = vld [vmem:[#allocation8 + $0x1d0] sm:$0xff]  }
  0xa6   :  { %2254 = vmatpush3.bf16.msra.mxu0 %v2374_v41 }
  0xa7   :  { %2255 = vmatprep.subr.bf16.mxu0 %v2376_v43  ;;  %v2399_v43 = vld [vmem:[#allocation8 + $0x190] sm:$0xff]  }
  0xaa   :  { %2256 = vmatpush3.bf16.msra.mxu0 %v2378_v45  ;;  %v149_v45 = vrot.slane %v2937_v56, %v148_v37  ;;  %v2440_v37 = vld [vmem:[#allocation11] ss:$24 sps:$4 sm:$0xff]  }
  0xab   :  { %2285 = vmatprep.subr.bf16.mxu0 %v2381_v48  ;;  %v136_v48 = vsub.s32 4, %v2932_v54 }
 0x148   :  { %v241_v60 = vpop.f32.mrb[0].mxu0 }
 0x149   :  { %v242_v61 = vadd.f32 %v241_v60, %v121_v58  ;;  %v243_v62 = vpop.f32.mrb[1].mxu0  ;;  %v2404_v60 = vld [vmem:[#allocation8 + $0x170] sm:$0xff]  }
 0x14a   :  { %v244_v1 = vadd.f32 %v243_v62, %v125_v59  ;;  %v245_v2 = vpop.f32.mrb[2].mxu0  ;;  %v137_v59 = vrot.slane %v2937_v56, %v136_v48 }
 0x14b   :  { %v371_v4 = vmax.f32 %v242_v61, 0.0  ;;  %v246_v5 = vpop.f32.mrb[3].mxu0  ;;  %v2405_v61 = vld [vmem:[#allocation8 + $0x1e0] sm:$0xff]   ;;  %v2406_v2 = vld [vmem:[#allocation8 + $0x130] sm:$0xff]  }
 0x14c   :  { %v372_v6 = vmax.f32 %v244_v1, 0.0 }
 0x14d   :  { %v379_v11 = vpack.c.bf16 %v371_v4, %v371_v4  ;;  %v2407_v4 = vld [vmem:[#allocation8 + $0x1a0] sm:$0xff]  }
 0x14e   :  { %v380_v8 = vpack.c.bf16 %v372_v6, %v372_v6 }
 0x150   :  { %v282_v13 = vpop.f32.mrb[4].mxu0  ;;  %938 = vmatprep.mubr.bf16.mxu0 %v380_v8  ;;  %v2409_v8 = vld [vmem:[#allocation8 + $0x1e8] sm:$0xff]  }
 0x151   :  { %v283_v14 = vadd.f32 %v282_v13, %v129_v7  ;;  %v284_v15 = vpop.f32.mrb[5].mxu0  ;;  %939 = vmatmul.mubr.bf16.vlgmr.msra.gmra.mrb[16].mxu0 %v379_v11  ;;  %v2408_v7 = vld [vmem:[#allocation8 + $0x178] sm:$0xff]   ;;  %v2411_v11 = vld [vmem:[#allocation8 + $0x1a8] sm:$0xff]  }
 0x152   :  { %v285_v16 = vadd.f32 %v284_v15, %v133_v9  ;;  %2286 = vmatpush3.bf16.msra.mxu0 %v2383_v10  ;;  %v286_v17 = vpop.f32.mrb[6].mxu0  ;;  %v144_v9 = vsub.s32 6, %v2932_v54  ;;  %v2410_v10 = vld [vmem:[#allocation8 + $0x138] sm:$0xff]   ;;  %v2413_v15 = vld [vmem:[#allocation8 + $0x1b0] sm:$0xff]  }
 0x153   :  { %v373_v20 = vmax.f32 %v283_v14, 0.0  ;;  %v287_v21 = vpop.f32.mrb[7].mxu0  ;;  %2287 = vmatprep.subr.bf16.mxu0 %v2385_v12  ;;  %v2412_v14 = vld [vmem:[#allocation8 + $0x1f0] sm:$0xff]  }
 0x154   :  { %v374_v23 = vmax.f32 %v285_v16, 0.0  ;;  %v145_v13 = vrot.slane %v2937_v56, %v144_v9  ;;  %v2418_v56 = vld [vmem:[#allocation10 + $0x4] ss:$8 sps:$4 sm:$0xff]   ;;  %v2518_v9 = vld [vmem:[#allocation11 + $0x270] ss:$24 sps:$4 sm:$0xff]  }
 0x155   :  { %v381_v28 = vpack.c.bf16 %v373_v20, %v373_v20  ;;  %v2415_v20 = vld [vmem:[#allocation8 + $0x1b8] sm:$0xff]  }
 0x156   :  { %2288 = vmatpush3.bf16.msra.mxu0 %v2387_v18  ;;  %v382_v24 = vpack.c.bf16 %v374_v23, %v374_v23  ;;  %v2414_v18 = vld [vmem:[#allocation8 + $0x1f8] sm:$0xff]   ;;  %v2416_v23 = vld [vmem:[#allocation10] ss:$8 sps:$4 sm:$0xff]  }
 0x157   :  { %2289 = vmatprep.subr.bf16.mxu0 %v2388_v22 }
 0x158   :  { %978 = vmatprep.mubr.bf16.mxu1 %v382_v24  ;;  %v323_v31 = vpop.f32.mrb[8].mxu0  ;;  %v2421_v24 = vld [vmem:[#allocation10 + $0x14] ss:$8 sps:$4 sm:$0xff]  }
 0x159   :  { %979 = vmatmul.mubr.bf16.vlgmr.msra.gmra.mrb[0].mxu1 %v381_v28  ;;  %v325_v32 = vpop.f32.mrb[9].mxu0  ;;  %v324_v6 = vadd.f32 %v323_v31, %v137_v59  ;;  %v2427_v28 = vld [vmem:[#allocation10 + $0x34] ss:$8 sps:$4 sm:$0xff]   ;;  %v2431_v31 = vld [vmem:[#allocation10 + $0x50] ss:$8 sps:$4 sm:$0xff]  }
 0x15a   :  { %2290 = vmatpush3.bf16.msra.mxu0 %v2390_v25  ;;  %2308 = vmatpush3.bf16.msra.mxu1 %v2391_v26  ;;  %v326_v35 = vadd.f32 %v325_v32, %v141_v27  ;;  %v327_v36 = vpop.f32.mrb[10].mxu0  ;;  %v2419_v25 = vld [vmem:[#allocation10 + $0x10] ss:$8 sps:$4 sm:$0xff]   ;;  %v2424_v26 = vld [vmem:[#allocation10 + $0x24] ss:$8 sps:$4 sm:$0xff]  }
 0x15b   :  { %2291 = vmatprep.subr.bf16.mxu0 %v2392_v29  ;;  %2309 = vmatprep.subr.bf16.mxu1 %v2393_v30  ;;  %v328_v40 = vpop.f32.mrb[11].mxu0  ;;  %v375_v12 = vmax.f32 %v324_v6, 0.0  ;;  %v2422_v27 = vld [vmem:[#allocation10 + $0x20] ss:$8 sps:$4 sm:$0xff]   ;;  %v2425_v29 = vld [vmem:[#allocation10 + $0x30] ss:$8 sps:$4 sm:$0xff]  }
 0x15c   :  { %v376_v41 = vmax.f32 %v326_v35, 0.0  ;;  %v2428_v30 = vld [vmem:[#allocation10 + $0x40] ss:$8 sps:$4 sm:$0xff]   ;;  %v2433_v32 = vld [vmem:[#allocation10 + $0x54] ss:$8 sps:$4 sm:$0xff]  }
 0x15d   :  { %v383_v16 = vpack.c.bf16 %v375_v12, %v375_v12  ;;  %v2439_v35 = vld [vmem:[#allocation10 + $0x74] ss:$8 sps:$4 sm:$0xff]   ;;  %v2437_v36 = vld [vmem:[#allocation10 + $0x70] ss:$8 sps:$4 sm:$0xff]  }
 0x15e   :  { %2292 = vmatpush3.bf16.msra.mxu0 %v2394_v33  ;;  %2310 = vmatpush3.bf16.msra.mxu1 %v2395_v34  ;;  %v384_v44 = vpack.c.bf16 %v376_v41, %v376_v41  ;;  %v2436_v33 = vld [vmem:[#allocation10 + $0x64] ss:$8 sps:$4 sm:$0xff]   ;;  %v2434_v34 = vld [vmem:[#allocation10 + $0x60] ss:$8 sps:$4 sm:$0xff]  }
 0x15f   :  { %2293 = vmatprep.subr.bf16.mxu0 %v2396_v38  ;;  %2311 = vmatprep.subr.bf16.mxu1 %v2397_v39  ;;  %v2442_v38 = vld [vmem:[#allocation11 + $0x4] ss:$24 sps:$4 sm:$0xff]   ;;  %v2448_v40 = vld [vmem:[#allocation11 + $0x34] ss:$24 sps:$4 sm:$0xff]   ;;  %v2446_v41 = vld [vmem:[#allocation11 + $0x30] ss:$24 sps:$4 sm:$0xff]  }
 0x160   :  { %v364_v49 = vpop.f32.mrb[12].mxu0  ;;  %1018 = vmatprep.mubr.bf16.mxu0 %v384_v44  ;;  %v2445_v39 = vld [vmem:[#allocation11 + $0xc] ss:$24 sps:$4 sm:$0xff]  }
 0x161   :  { %v366_v50 = vpop.f32.mrb[13].mxu0  ;;  %v365_v17 = vadd.f32 %v364_v49, %v145_v13  ;;  %v2460_v44 = vld [vmem:[#allocation11 + $0x94] ss:$24 sps:$4 sm:$0xff]   ;;  %v2490_v59 = vld [vmem:[#allocation11 + $0x184] ss:$24 sps:$4 sm:$0xff]  }
 0x162   :  { %2294 = vmatpush3.bf16.msra.mxu0 %v2398_v42  ;;  %2312 = vmatpush3.bf16.msra.mxu1 %v2399_v43  ;;  %v367_v53 = vadd.f32 %v366_v50, %v149_v45  ;;  %v368_v58 = vpop.f32.mrb[14].mxu0  ;;  %v2454_v42 = vld [vmem:[#allocation11 + $0x64] ss:$24 sps:$4 sm:$0xff]   ;;  %v2452_v43 = vld [vmem:[#allocation11 + $0x60] ss:$24 sps:$4 sm:$0xff]  }
 0x163   :  { %2295 = vmatprep.subr.bf16.mxu0 %v2400_v46  ;;  %2313 = vmatprep.subr.bf16.mxu1 %v2401_v47  ;;  %v369_v62 = vpop.f32.mrb[15].mxu0  ;;  %v377_v21 = vmax.f32 %v365_v17, 0.0  ;;  %v2458_v45 = vld [vmem:[#allocation11 + $0x90] ss:$24 sps:$4 sm:$0xff]   ;;  %v2466_v46 = vld [vmem:[#allocation11 + $0xc4] ss:$24 sps:$4 sm:$0xff]  }
 0x164   :  { %v378_v1 = vmax.f32 %v367_v53, 0.0  ;;  %v2464_v47 = vld [vmem:[#allocation11 + $0xc0] ss:$24 sps:$4 sm:$0xff]   ;;  %v2472_v49 = vld [vmem:[#allocation11 + $0xf4] ss:$24 sps:$4 sm:$0xff]  }
 0x165   :  { %v385_v22 = vpack.c.bf16 %v377_v21, %v377_v21  ;;  %v2470_v50 = vld [vmem:[#allocation11 + $0xf0] ss:$24 sps:$4 sm:$0xff]   ;;  %v2484_v53 = vld [vmem:[#allocation11 + $0x154] ss:$24 sps:$4 sm:$0xff]   ;;  %v2514_v6 = vld [vmem:[#allocation11 + $0x244] ss:$24 sps:$4 sm:$0xff]  }
 0x166   :  { %2296 = vmatpush3.bf16.msra.mxu0 %v2402_v51  ;;  %2314 = vmatpush3.bf16.msra.mxu1 %v2403_v52  ;;  %v386_v5 = vpack.c.bf16 %v378_v1, %v378_v1  ;;  %v2478_v51 = vld [vmem:[#allocation11 + $0x124] ss:$24 sps:$4 sm:$0xff]   ;;  %v2476_v52 = vld [vmem:[#allocation11 + $0x120] ss:$24 sps:$4 sm:$0xff]   ;;  %v2482_v58 = vld [vmem:[#allocation11 + $0x150] ss:$24 sps:$4 sm:$0xff]  }
 0x167   :  { %2297 = vmatprep.subr.bf16.mxu0 %v2404_v60  ;;  %2315 = vmatprep.subr.bf16.mxu1 %v2405_v61  ;;  %v2488_v60 = vld [vmem:[#allocation11 + $0x180] ss:$24 sps:$4 sm:$0xff]   ;;  %v2496_v61 = vld [vmem:[#allocation11 + $0x1b4] ss:$24 sps:$4 sm:$0xff]   ;;  %v2494_v62 = vld [vmem:[#allocation11 + $0x1b0] ss:$24 sps:$4 sm:$0xff]  }
 0x168   :  { %1058 = vmatprep.mubr.bf16.mxu1 %v386_v5  ;;  %v2502_v1 = vld [vmem:[#allocation11 + $0x1e4] ss:$24 sps:$4 sm:$0xff]   ;;  %v2506_v5 = vld [vmem:[#allocation11 + $0x210] ss:$24 sps:$4 sm:$0xff]  }
 0x16a   :  { %2298 = vmatpush3.bf16.msra.mxu0 %v2406_v2  ;;  %2316 = vmatpush3.bf16.msra.mxu1 %v2407_v4  ;;  %v2500_v2 = vld [vmem:[#allocation11 + $0x1e0] ss:$24 sps:$4 sm:$0xff]   ;;  %v2508_v4 = vld [vmem:[#allocation11 + $0x214] ss:$24 sps:$4 sm:$0xff]  }
 0x16b   :  { %2299 = vmatprep.subr.bf16.mxu0 %v2408_v7  ;;  %2317 = vmatprep.subr.bf16.mxu1 %v2409_v8  ;;  %v2512_v7 = vld [vmem:[#allocation11 + $0x240] ss:$24 sps:$4 sm:$0xff]   ;;  %v2520_v8 = vld [vmem:[#allocation11 + $0x274] ss:$24 sps:$4 sm:$0xff]  }
 0x16e   :  { %2300 = vmatpush3.bf16.msra.mxu0 %v2410_v10  ;;  %2318 = vmatpush3.bf16.msra.mxu1 %v2411_v11 }
 0x16f   :  { %2319 = vmatprep.subr.bf16.mxu1 %v2412_v14  ;;  %1176 = vmatprep.subr.bf16.mxu0 %v2418_v56 }
 0x171   :  { %1019 = vmatmul.mubr.bf16.vlgmr.msra.gmra.mrb[20].mxu0 %v383_v16 }
 0x172   :  { %2320 = vmatpush3.bf16.msra.mxu1 %v2413_v15  ;;  %1208 = vmatprep.mubr.bf16.mxu0 %v2784_v0  ;;  %v2430_v0 = vld [vmem:[#allocation10 + $0x44] ss:$8 sps:$4 sm:$0xff]  }
 0x173   :  { %2321 = vmatprep.subr.bf16.mxu1 %v2414_v18  ;;  %1177 = vmatpush1.bf16.msra.mxu0 %v2416_v23  ;;  %v2057_v15 = vld [vmem:[%s3010_s4] ss:$0 sm:$0xff] }
 0x174   :  { %1178 = vmatprep.subr.bf16.mxu0 %v2421_v24 }
 0x176   :  { %2322 = vmatpush3.bf16.msra.mxu1 %v2415_v20 }
 0x177   :  { %1179 = vmatpush1.bf16.msra.mxu0 %v2419_v25  ;;  %1829 = vmatprep.subr.bf16.mxu1 %v2442_v38  ;;  %v2449_v38 = vld [vmem:[#allocation11 + $0x38] ss:$24 sps:$4 sm:$0xff]  }
 0x178   :  { %1180 = vmatprep.subr.bf16.mxu0 %v2424_v26 }
 0x179   :  { %1059 = vmatmul.mubr.bf16.vlgmr.msra.gmra.mrb[4].mxu1 %v385_v22 }
 0x17a   :  { %1830 = vmatpush1.bf16.msra.mxu1 %v2440_v37  ;;  %v2451_v37 = vld [vmem:[#allocation11 + $0x3c] ss:$24 sps:$4 sm:$0xff]  }
 0x17b   :  { %1181 = vmatpush1.bf16.msra.mxu0 %v2422_v27  ;;  %1831 = vmatprep.subr.bf16.mxu1 %v2448_v40  ;;  %v2455_v40 = vld [vmem:[#allocation11 + $0x68] ss:$24 sps:$4 sm:$0xff]  }
 0x17c   :  { %1182 = vmatprep.subr.bf16.mxu0 %v2427_v28 }
 0x17e   :  { %1832 = vmatpush1.bf16.msra.mxu1 %v2446_v41  ;;  %v2463_v41 = vld [vmem:[#allocation11 + $0x9c] ss:$24 sps:$4 sm:$0xff]  }
 0x17f   :  { %1183 = vmatpush1.bf16.msra.mxu0 %v2425_v29  ;;  %1833 = vmatprep.subr.bf16.mxu1 %v2454_v42  ;;  %v2461_v42 = vld [vmem:[#allocation11 + $0x98] ss:$24 sps:$4 sm:$0xff]  }
 0x180   :  { %1184 = vmatprep.subr.bf16.mxu0 %v2430_v0 }
 0x182   :  { %1834 = vmatpush1.bf16.msra.mxu1 %v2452_v43  ;;  %v2469_v43 = vld [vmem:[#allocation11 + $0xcc] ss:$24 sps:$4 sm:$0xff]  }
 0x183   :  { %1185 = vmatpush1.bf16.msra.mxu0 %v2428_v30  ;;  %1835 = vmatprep.subr.bf16.mxu1 %v2460_v44  ;;  %v2467_v44 = vld [vmem:[#allocation11 + $0xc8] ss:$24 sps:$4 sm:$0xff]  }
 0x184   :  { %1186 = vmatprep.subr.bf16.mxu0 %v2433_v32 }
 0x186   :  { %1836 = vmatpush1.bf16.msra.mxu1 %v2458_v45  ;;  %v2475_v45 = vld [vmem:[#allocation11 + $0xfc] ss:$24 sps:$4 sm:$0xff]  }
 0x187   :  { %1187 = vmatpush1.bf16.msra.mxu0 %v2431_v31  ;;  %1837 = vmatprep.subr.bf16.mxu1 %v2466_v46  ;;  %v2473_v46 = vld [vmem:[#allocation11 + $0xf8] ss:$24 sps:$4 sm:$0xff]  }
 0x188   :  { %1188 = vmatprep.subr.bf16.mxu0 %v2436_v33 }
 0x18a   :  { %1838 = vmatpush1.bf16.msra.mxu1 %v2464_v47  ;;  %v2481_v47 = vld [vmem:[#allocation11 + $0x12c] ss:$24 sps:$4 sm:$0xff]  }
 0x18b   :  { %1189 = vmatpush1.bf16.msra.mxu0 %v2434_v34  ;;  %1839 = vmatprep.subr.bf16.mxu1 %v2472_v49  ;;  %v2479_v49 = vld [vmem:[#allocation11 + $0x128] ss:$24 sps:$4 sm:$0xff]  }
 0x18c   :  { %1190 = vmatprep.subr.bf16.mxu0 %v2439_v35  ;;  %v2443_v35 = vld [vmem:[#allocation11 + $0x8] ss:$24 sps:$4 sm:$0xff]  }
 0x18e   :  { %1840 = vmatpush1.bf16.msra.mxu1 %v2470_v50  ;;  %v2487_v50 = vld [vmem:[#allocation11 + $0x15c] ss:$24 sps:$4 sm:$0xff]  }
 0x18f   :  { %1191 = vmatpush1.bf16.msra.mxu0 %v2437_v36  ;;  %1841 = vmatprep.subr.bf16.mxu1 %v2478_v51  ;;  %v2485_v51 = vld [vmem:[#allocation11 + $0x158] ss:$24 sps:$4 sm:$0xff]  }
 0x190   :  { %1870 = vmatprep.subr.bf16.mxu0 %v2445_v39  ;;  %v2457_v39 = vld [vmem:[#allocation11 + $0x6c] ss:$24 sps:$4 sm:$0xff]  }
 0x192   :  { %1842 = vmatpush1.bf16.msra.mxu1 %v2476_v52  ;;  %v2493_v52 = vld [vmem:[#allocation11 + $0x18c] ss:$24 sps:$4 sm:$0xff]  }
 0x193   :  { %1843 = vmatprep.subr.bf16.mxu1 %v2484_v53  ;;  %v2491_v53 = vld [vmem:[#allocation11 + $0x188] ss:$24 sps:$4 sm:$0xff]  }
 0x196   :  { %1844 = vmatpush1.bf16.msra.mxu1 %v2482_v58  ;;  %v2499_v58 = vld [vmem:[#allocation11 + $0x1bc] ss:$24 sps:$4 sm:$0xff]  }
 0x197   :  { %1845 = vmatprep.subr.bf16.mxu1 %v2490_v59  ;;  %v2497_v59 = vld [vmem:[#allocation11 + $0x1b8] ss:$24 sps:$4 sm:$0xff]  }
 0x19a   :  { %1846 = vmatpush1.bf16.msra.mxu1 %v2488_v60  ;;  %v2505_v60 = vld [vmem:[#allocation11 + $0x1ec] ss:$24 sps:$4 sm:$0xff]  }
 0x19b   :  { %1847 = vmatprep.subr.bf16.mxu1 %v2496_v61  ;;  %v2503_v61 = vld [vmem:[#allocation11 + $0x1e8] ss:$24 sps:$4 sm:$0xff]  }
 0x19e   :  { %1848 = vmatpush1.bf16.msra.mxu1 %v2494_v62  ;;  %v2511_v62 = vld [vmem:[#allocation11 + $0x21c] ss:$24 sps:$4 sm:$0xff]  }
 0x19f   :  { %1849 = vmatprep.subr.bf16.mxu1 %v2502_v1  ;;  %v2509_v1 = vld [vmem:[#allocation11 + $0x218] ss:$24 sps:$4 sm:$0xff]  }
 0x1a2   :  { %1850 = vmatpush1.bf16.msra.mxu1 %v2500_v2  ;;  %v2517_v2 = vld [vmem:[#allocation11 + $0x24c] ss:$24 sps:$4 sm:$0xff]  }
 0x1a3   :  { %1851 = vmatprep.subr.bf16.mxu1 %v2508_v4  ;;  %v2515_v4 = vld [vmem:[#allocation11 + $0x248] ss:$24 sps:$4 sm:$0xff]  }
 0x1a6   :  { %1852 = vmatpush1.bf16.msra.mxu1 %v2506_v5  ;;  %v2523_v5 = vld [vmem:[#allocation11 + $0x27c] ss:$24 sps:$4 sm:$0xff]  }
 0x1a7   :  { %1853 = vmatprep.subr.bf16.mxu1 %v2514_v6  ;;  %v2521_v6 = vld [vmem:[#allocation11 + $0x278] ss:$24 sps:$4 sm:$0xff]  }
 0x1aa   :  { %1854 = vmatpush1.bf16.msra.mxu1 %v2512_v7  ;;  %v2526_v7 = vld [vmem:[#allocation11 + $0x2a4] ss:$24 sps:$4 sm:$0xff]  }
 0x1ab   :  { %1855 = vmatprep.subr.bf16.mxu1 %v2520_v8  ;;  %v2524_v8 = vld [vmem:[#allocation11 + $0x2a0] ss:$24 sps:$4 sm:$0xff]  }
 0x1ae   :  { %1856 = vmatpush1.bf16.msra.mxu1 %v2518_v9  ;;  %v2529_v9 = vld [vmem:[#allocation11 + $0x2ac] ss:$24 sps:$4 sm:$0xff]  }
 0x1af   :  { %1857 = vmatprep.subr.bf16.mxu1 %v2526_v7 }
 0x1b2   :  { %1858 = vmatpush1.bf16.msra.mxu1 %v2524_v8 }
 0x224   :  { %v2257_v10 = vpop.f32.mrb[16].mxu0 }
 0x225   :  { %v2258_v11 = vpop.f32.mrb[17].mxu0 }
 0x226   :  { %v2259_v12 = vadd.f32 %v2258_v11, %v2257_v10  ;;  %v2260_v13 = vpop.f32.mrb[18].mxu0  ;;  %v2527_v10 = vld [vmem:[#allocation11 + $0x2a8] ss:$24 sps:$4 sm:$0xff]   ;;  %v2532_v11 = vld [vmem:[#allocation11 + $0x2d4] ss:$24 sps:$4 sm:$0xff]  }
 0x227   :  { %v2261_v14 = vpop.f32.mrb[19].mxu0  ;;  %v2535_v13 = vld [vmem:[#allocation11 + $0x2dc] ss:$24 sps:$4 sm:$0xff]   ;;  %1859 = vmatprep.subr.bf16.mxu1 %v2532_v11 }
 0x228   :  { %v941_v18 = vadd.f32 %v2259_v12, %v2057_v15  ;;  %v2530_v12 = vld [vmem:[#allocation11 + $0x2d0] ss:$24 sps:$4 sm:$0xff]   ;;  %v2538_v15 = vld [vmem:[#allocation11 + $0x14] ss:$24 sps:$4 sm:$0xff]  }
 0x229   :  { %v2533_v14 = vld [vmem:[#allocation11 + $0x2d8] ss:$24 sps:$4 sm:$0xff]   ;;  %1860 = vmatpush1.bf16.msra.mxu1 %v2530_v12 }
 0x22a   :  { %1911 = vmatprep.subr.bf16.mxu1 %v2538_v15 }
 0x22c   :  { %v2279_v16 = vpop.f32.mrb[0].mxu1 }
 0x22d   :  { %v2280_v17 = vpop.f32.mrb[1].mxu1 }
 0x22e   :  { %v2281_v20 = vadd.f32 %v2280_v17, %v2279_v16  ;;  %v2282_v21 = vpop.f32.mrb[2].mxu1  ;;  %v1084_v16 = vld [vmem:[%s3012_s6] sm:$0x3] }
 0x22f   :  { %v2283_v22 = vpop.f32.mrb[3].mxu1  ;;  %v1089_v17 = vrot.slane %v1084_v16, %v2935_v55 }
 0x230   :  { %v981_v23 = vadd.f32 %v2281_v20, %v941_v18  ;;  %v1093_v18 = vrot.slane %v1084_v16, %v2940_v57 }
 0x244   :  { %v2301_v56 = vpop.f32.mrb[20].mxu0 }
 0x245   :  { %v2302_v24 = vpop.f32.mrb[21].mxu0 }
 0x246   :  { %v2303_v25 = vadd.f32 %v2302_v24, %v2301_v56  ;;  %v2304_v26 = vpop.f32.mrb[22].mxu0 }
 0x247   :  { %v2305_v27 = vpop.f32.mrb[23].mxu0 }
 0x248   :  { %v1021_v28 = vadd.f32 %v2303_v25, %v981_v23 }
 0x24c   :  { %v2323_v29 = vpop.f32.mrb[4].mxu1 }
 0x24d   :  { %v2324_v0 = vpop.f32.mrb[5].mxu1 }
 0x24e   :  { %v2325_v30 = vadd.f32 %v2324_v0, %v2323_v29  ;;  %v2326_v31 = vpop.f32.mrb[6].mxu1  ;;  %v2541_v0 = vld [vmem:[#allocation11 + $0x44] ss:$24 sps:$4 sm:$0xff]  }
 0x24f   :  { %v2327_v32 = vpop.f32.mrb[7].mxu1  ;;  %v2544_v31 = vld [vmem:[#allocation11 + $0x74] ss:$24 sps:$4 sm:$0xff]  }
 0x250   :  { %v1061_v33 = vadd.f32 %v2325_v30, %v1021_v28  ;;  %v2536_v28 = vld [vmem:[#allocation11 + $0x10] ss:$24 sps:$4 sm:$0xff]   ;;  %v2539_v30 = vld [vmem:[#allocation11 + $0x40] ss:$24 sps:$4 sm:$0xff]  }
 0x251   :  { %v2542_v32 = vld [vmem:[#allocation11 + $0x70] ss:$24 sps:$4 sm:$0xff]  }
 0x252   :  { %v1066_v34 = vmax.f32 %v1061_v33, 0.0  ;;  %v2547_v33 = vld [vmem:[#allocation11 + $0xa4] ss:$24 sps:$4 sm:$0xff]  }
 0x254   :  { %v1067_v36 = vpack.c.bf16 %v1066_v34, %v1066_v34  ;;  %v2545_v34 = vld [vmem:[#allocation11 + $0xa0] ss:$24 sps:$4 sm:$0xff]  }
 0x256   :  { %1209 = vmatmul.mubr.bf16.vlgmr.msra.gmra.mrb[24].mxu0 %v1067_v36  ;;  %v2548_v36 = vld [vmem:[#allocation11 + $0xd0] ss:$24 sps:$4 sm:$0xff]  }
 0x257   :  { %1871 = vmatpush1.bf16.msra.mxu0 %v2443_v35  ;;  %v2550_v35 = vld [vmem:[#allocation11 + $0xd4] ss:$24 sps:$4 sm:$0xff]  }
 0x258   :  { %1872 = vmatprep.subr.bf16.mxu0 %v2451_v37  ;;  %v2553_v37 = vld [vmem:[#allocation11 + $0x104] ss:$24 sps:$4 sm:$0xff]  }
 0x25b   :  { %1873 = vmatpush1.bf16.msra.mxu0 %v2449_v38  ;;  %v2551_v38 = vld [vmem:[#allocation11 + $0x100] ss:$24 sps:$4 sm:$0xff]  }
 0x25c   :  { %1874 = vmatprep.subr.bf16.mxu0 %v2457_v39  ;;  %v2556_v39 = vld [vmem:[#allocation11 + $0x134] ss:$24 sps:$4 sm:$0xff]  }
 0x25f   :  { %1875 = vmatpush1.bf16.msra.mxu0 %v2455_v40  ;;  %v2554_v40 = vld [vmem:[#allocation11 + $0x130] ss:$24 sps:$4 sm:$0xff]  }
 0x260   :  { %1876 = vmatprep.subr.bf16.mxu0 %v2463_v41  ;;  %v2559_v41 = vld [vmem:[#allocation11 + $0x164] ss:$24 sps:$4 sm:$0xff]  }
 0x263   :  { %1877 = vmatpush1.bf16.msra.mxu0 %v2461_v42  ;;  %v2557_v42 = vld [vmem:[#allocation11 + $0x160] ss:$24 sps:$4 sm:$0xff]  }
 0x264   :  { %1878 = vmatprep.subr.bf16.mxu0 %v2469_v43  ;;  %v2562_v43 = vld [vmem:[#allocation11 + $0x194] ss:$24 sps:$4 sm:$0xff]  }
 0x267   :  { %1879 = vmatpush1.bf16.msra.mxu0 %v2467_v44  ;;  %v2560_v44 = vld [vmem:[#allocation11 + $0x190] ss:$24 sps:$4 sm:$0xff]  }
 0x268   :  { %1880 = vmatprep.subr.bf16.mxu0 %v2475_v45  ;;  %v2565_v45 = vld [vmem:[#allocation11 + $0x1c4] ss:$24 sps:$4 sm:$0xff]  }
 0x26b   :  { %1881 = vmatpush1.bf16.msra.mxu0 %v2473_v46  ;;  %v2563_v46 = vld [vmem:[#allocation11 + $0x1c0] ss:$24 sps:$4 sm:$0xff]  }
 0x26c   :  { %1882 = vmatprep.subr.bf16.mxu0 %v2481_v47  ;;  %v2568_v47 = vld [vmem:[#allocation11 + $0x1f4] ss:$24 sps:$4 sm:$0xff]  }
 0x26f   :  { %1883 = vmatpush1.bf16.msra.mxu0 %v2479_v49  ;;  %v2566_v49 = vld [vmem:[#allocation11 + $0x1f0] ss:$24 sps:$4 sm:$0xff]  }
 0x270   :  { %1884 = vmatprep.subr.bf16.mxu0 %v2487_v50  ;;  %v2571_v50 = vld [vmem:[#allocation11 + $0x224] ss:$24 sps:$4 sm:$0xff]  }
 0x273   :  { %1885 = vmatpush1.bf16.msra.mxu0 %v2485_v51  ;;  %v2569_v51 = vld [vmem:[#allocation11 + $0x220] ss:$24 sps:$4 sm:$0xff]  }
 0x274   :  { %1886 = vmatprep.subr.bf16.mxu0 %v2493_v52  ;;  %v2574_v52 = vld [vmem:[#allocation11 + $0x254] ss:$24 sps:$4 sm:$0xff]  }
 0x277   :  { %1887 = vmatpush1.bf16.msra.mxu0 %v2491_v53  ;;  %v2572_v53 = vld [vmem:[#allocation11 + $0x250] ss:$24 sps:$4 sm:$0xff]  }
 0x278   :  { %1888 = vmatprep.subr.bf16.mxu0 %v2499_v58  ;;  %v2577_v58 = vld [vmem:[#allocation11 + $0x284] ss:$24 sps:$4 sm:$0xff]  }
 0x27b   :  { %1889 = vmatpush1.bf16.msra.mxu0 %v2497_v59  ;;  %v2575_v59 = vld [vmem:[#allocation11 + $0x280] ss:$24 sps:$4 sm:$0xff]  }
 0x27c   :  { %1890 = vmatprep.subr.bf16.mxu0 %v2505_v60  ;;  %v2580_v60 = vld [vmem:[#allocation11 + $0x2b4] ss:$24 sps:$4 sm:$0xff]  }
 0x27f   :  { %1891 = vmatpush1.bf16.msra.mxu0 %v2503_v61  ;;  %v2578_v61 = vld [vmem:[#allocation11 + $0x2b0] ss:$24 sps:$4 sm:$0xff]  }
 0x280   :  { %1892 = vmatprep.subr.bf16.mxu0 %v2511_v62  ;;  %v2583_v62 = vld [vmem:[#allocation11 + $0x2e4] ss:$24 sps:$4 sm:$0xff]  }
 0x283   :  { %1893 = vmatpush1.bf16.msra.mxu0 %v2509_v1  ;;  %v2581_v1 = vld [vmem:[#allocation11 + $0x2e0] ss:$24 sps:$4 sm:$0xff]  }
 0x284   :  { %1894 = vmatprep.subr.bf16.mxu0 %v2517_v2  ;;  %v1317_v2 = vld [vmem:[%s3014_s8] sm:$0x3f]  ;;  %s2786_s8 = smov [#allocation13]  }
 0x285   :  { %v1334_v7 = vrot.slane %v1317_v2, %v132_v3  ;;  %s2029_s20 = sshll.u32 %s2786_s8, 4  ;;  %s2030_s20 = int_to_ptr.vmem [resolvable:$true] %s2029_s20 }
 0x286   :  { %s2740_s21 = scalar_lea.vmem %s2030_s20, 192  ;;  %p2745_p7 = scmp.lt.s32.totalorder %s2030_s20, %s2030_s20 }
 0x287   :  { %1895 = vmatpush1.bf16.msra.mxu0 %v2515_v4  ;;  %v1322_v4 = vrot.slane %v1317_v2, %v2935_v55  ;;  %p2741_p6 = scmp.ne.s32.totalorder %s2030_s20, %s2740_s21  ;;  %p2746_p8 = scmp.lt.s32.totalorder %s2740_s21, %s2740_s21 }
 0x288   :  { %1896 = vmatprep.subr.bf16.mxu0 %v2523_v5  ;;  %v1330_v5 = vrot.slane %v1317_v2, %v128_v63 }
 0x289   :  { %p2747_p9 = por %p2746_p8, %p2745_p7 }
 0x28b   :  { %1897 = vmatpush1.bf16.msra.mxu0 %v2521_v6  ;;  %v1326_v6 = vrot.slane %v1317_v2, %v2940_v57  ;;  %p2748_p10 = pnand %p2747_p9, %p2741_p6 }
 0x28c   :  { %1898 = vmatprep.subr.bf16.mxu0 %v2529_v9 }
 0x28f   :  { %1899 = vmatpush1.bf16.msra.mxu0 %v2527_v10 }
 0x290   :  { %1900 = vmatprep.subr.bf16.mxu0 %v2535_v13 }
 0x293   :  { %1901 = vmatpush1.bf16.msra.mxu0 %v2533_v14 }
 0x329   :  { %v1210_v20 = vpop.f32.mrb[24].mxu0 }
 0x32a   :  { %v1211_v21 = vadd.f32 %v1210_v20, %v1089_v17  ;;  %v1212_v22 = vpop.f32.mrb[25].mxu0 }
 0x32b   :  { %v1213_v23 = vadd.f32 %v1212_v22, %v1093_v18  ;;  %v1214_v56 = vpop.f32.mrb[26].mxu0 }
 0x32c   :  { %v1217_v24 = vmax.f32 %v1211_v21, 0.0  ;;  %v1215_v25 = vpop.f32.mrb[27].mxu0 }
 0x32d   :  { %v1218_v26 = vmax.f32 %v1213_v23, 0.0 }
 0x32e   :  { %v2975_v29 = vpack.c.bf16 %v1217_v24, %v1217_v24 }
 0x32f   :  { %v1220_v27 = vpack.c.bf16 %v1218_v26, %v1218_v26 }
 0x331   :  { %1861 = vmatprep.mubr.bf16.mxu1 %v1220_v27  ;;  %1902 = vmatprep.mubr.bf16.mxu0 %v1220_v27 }
 0x332   :  { %1862 = vmatmul.mubr.bf16.vlgmr.msra.gmra.mrb[8].mxu1 %v2975_v29  ;;  %1903 = vmatmul.mubr.bf16.vlgmr.msra.gmra.mrb[28].mxu0 %v2975_v29 }
 0x333   :  { %1912 = vmatpush1.bf16.msra.mxu1 %v2536_v28  ;;  %1943 = vmatprep.mubr.bf16.mxu1 %v1220_v27  ;;  %v2785_v28 = vmov 1983009808  }
 0x334   :  { %1913 = vmatprep.subr.bf16.mxu1 %v2541_v0 }
 0x337   :  { %1914 = vmatpush1.bf16.msra.mxu1 %v2539_v30 }
 0x338   :  { %1915 = vmatprep.subr.bf16.mxu1 %v2544_v31 }
 0x33b   :  { %1916 = vmatpush1.bf16.msra.mxu1 %v2542_v32 }
 0x33c   :  { %1917 = vmatprep.subr.bf16.mxu1 %v2547_v33 }
 0x33f   :  { %1918 = vmatpush1.bf16.msra.mxu1 %v2545_v34 }
 0x340   :  { %1919 = vmatprep.subr.bf16.mxu1 %v2550_v35 }
 0x343   :  { %1920 = vmatpush1.bf16.msra.mxu1 %v2548_v36 }
 0x344   :  { %1921 = vmatprep.subr.bf16.mxu1 %v2553_v37 }
 0x347   :  { %1922 = vmatpush1.bf16.msra.mxu1 %v2551_v38 }
 0x348   :  { %1923 = vmatprep.subr.bf16.mxu1 %v2556_v39 }
 0x34b   :  { %1924 = vmatpush1.bf16.msra.mxu1 %v2554_v40  ;;  %v1338_v40 = vrot.slane %v1317_v2, %v136_v48 }
 0x34c   :  { %1925 = vmatprep.subr.bf16.mxu1 %v2559_v41  ;;  %v1342_v41 = vrot.slane %v1317_v2, %v140_v19 }
 0x34f   :  { %1926 = vmatpush1.bf16.msra.mxu1 %v2557_v42 }
 0x350   :  { %1927 = vmatprep.subr.bf16.mxu1 %v2562_v43 }
 0x353   :  { %1928 = vmatpush1.bf16.msra.mxu1 %v2560_v44 }
 0x354   :  { %1929 = vmatprep.subr.bf16.mxu1 %v2565_v45 }
 0x357   :  { %1930 = vmatpush1.bf16.msra.mxu1 %v2563_v46 }
 0x358   :  { %1931 = vmatprep.subr.bf16.mxu1 %v2568_v47 }
 0x35b   :  { %1932 = vmatpush1.bf16.msra.mxu1 %v2566_v49 }
 0x35c   :  { %1933 = vmatprep.subr.bf16.mxu1 %v2571_v50 }
 0x35f   :  { %1934 = vmatpush1.bf16.msra.mxu1 %v2569_v51 }
 0x360   :  { %1935 = vmatprep.subr.bf16.mxu1 %v2574_v52 }
 0x363   :  { %1936 = vmatpush1.bf16.msra.mxu1 %v2572_v53 }
 0x364   :  { %1937 = vmatprep.subr.bf16.mxu1 %v2577_v58 }
 0x367   :  { %1938 = vmatpush1.bf16.msra.mxu1 %v2575_v59 }
 0x368   :  { %1939 = vmatprep.subr.bf16.mxu1 %v2580_v60 }
 0x36b   :  { %1940 = vmatpush1.bf16.msra.mxu1 %v2578_v61 }
 0x36c   :  { %1941 = vmatprep.subr.bf16.mxu1 %v2583_v62 }
 0x36f   :  { %1942 = vmatpush1.bf16.msra.mxu1 %v2581_v1 }
 0x372   :  { %1944 = vmatmul.mubr.bf16.vlgmr.msra.gmra.mrb[12].mxu1 %v2975_v29  ;;  %v1997_v29 = vunpack.c.l.s4 %v2785_v28 }
 0x374   :  { %v1998_v0 = vunpack.c.0.s8 %v1997_v29 }
 0x376   :  { %v2001_v32 = vsub.s32 %v1998_v0, %v2932_v54 }
 0x405   :  { %v1863_v8 = vpop.f32.mrb[8].mxu1  ;;  %v1904_v9 = vpop.f32.mrb[28].mxu0 }
 0x406   :  { %v1864_v10 = vadd.f32 %v1863_v8, %v1322_v4  ;;  %v1905_v11 = vadd.f32 %v1904_v9, %v1330_v5  ;;  %v1865_v12 = vpop.f32.mrb[9].mxu1  ;;  %v1906_v13 = vpop.f32.mrb[29].mxu0 }
 0x407   :  { %v1866_v14 = vadd.f32 %v1865_v12, %v1326_v6  ;;  %v1907_v15 = vadd.f32 %v1906_v13, %v1334_v7  ;;  %v1867_v16 = vpop.f32.mrb[10].mxu1  ;;  %v1908_v17 = vpop.f32.mrb[30].mxu0 }
 0x408   :  { %v2234_v18 = vmul.f32 -1.442695, %v1864_v10  ;;  %v2236_v55 = vmul.f32 -1.442695, %v1905_v11  ;;  %v1868_v20 = vpop.f32.mrb[11].mxu1  ;;  %v1909_v21 = vpop.f32.mrb[31].mxu0 }
 0x409   :  { %v2235_v63 = vmul.f32 -1.442695, %v1866_v14  ;;  %v2237_v22 = vmul.f32 -1.442695, %v1907_v15 }
 0x40a   :  { %2584 = vpow2.f32 %v2234_v18 }
 0x40b   :  { %2586 = vpow2.f32 %v2236_v55 }
 0x40c   :  { %2588 = vpow2.f32 %v2235_v63 }
 0x40d   :  { %2590 = vpow2.f32 %v2237_v22 }
 0x414   :  { %v2585_v57 = vpop.eup %2584 }
 0x415   :  { %v2587_v3 = vpop.eup %2586  ;;  %v1970_v23 = vadd.f32 1.0, %v2585_v57 }
 0x416   :  { %v2589_v56 = vpop.eup %2588  ;;  %v1972_v24 = vadd.f32 1.0, %v2587_v3 }
 0x417   :  { %v2591_v25 = vpop.eup %2590  ;;  %2592 = vrcp.f32 %v1970_v23  ;;  %v1971_v26 = vadd.f32 1.0, %v2589_v56 }
 0x418   :  { %2594 = vrcp.f32 %v1972_v24  ;;  %v1973_v27 = vadd.f32 1.0, %v2591_v25 }
 0x419   :  { %2596 = vrcp.f32 %v1971_v26 }
 0x41a   :  { %2598 = vrcp.f32 %v1973_v27 }
 0x421   :  { %v2593_v30 = vpop.eup %2592 }
 0x422   :  { %v2595_v31 = vpop.eup %2594 }
 0x423   :  { %v2597_v33 = vpop.eup %2596 }
 0x424   :  { %v2599_v34 = vpop.eup %2598  ;;  %v1994_v35 = vcombine.low %v2593_v30, %v2597_v33 }
 0x425   :  { %v1995_v36 = vcombine.low %v2595_v31, %v2599_v34 }
 0x426   :  { %v2002_v37 = vrot.slane %v1994_v35, %v2001_v32 }
 0x427   :  { %v2009_v38 = vrot.slane %v1995_v36, %v2001_v32 }
 0x429   :  { %v2010_v39 = vcombine.low %v2002_v37, %v2009_v38 }
 0x42b   :  { %2021 = vst [vmem:[#allocation13] sm:$0xff] %v2010_v39 }
 0x445   :  { %v1945_v42 = vpop.f32.mrb[12].mxu1 }
 0x446   :  { %v1946_v43 = vadd.f32 %v1945_v42, %v1338_v40  ;;  %v1947_v44 = vpop.f32.mrb[13].mxu1 }
 0x447   :  { %v1948_v45 = vadd.f32 %v1947_v44, %v1342_v41  ;;  %v1949_v46 = vpop.f32.mrb[14].mxu1 }
 0x448   :  { %v2238_v47 = vmul.f32 -1.442695, %v1946_v43  ;;  %v1950_v49 = vpop.f32.mrb[15].mxu1 }
 0x449   :  { %v2239_v50 = vmul.f32 -1.442695, %v1948_v45 }
 0x44a   :  { %2600 = vpow2.f32 %v2238_v47 }
 0x44b   :  { %2602 = vpow2.f32 %v2239_v50 }
 0x454   :  { %v2601_v51 = vpop.eup %2600 }
 0x455   :  { %v2603_v52 = vpop.eup %2602  ;;  %v1974_v53 = vadd.f32 1.0, %v2601_v51 }
 0x456   :  { %v1975_v58 = vadd.f32 1.0, %v2603_v52 }
 0x457   :  { %2604 = vrcp.f32 %v1974_v53 }
 0x458   :  { %2606 = vrcp.f32 %v1975_v58 }
 0x461   :  { %v2605_v54 = vpop.eup %2604 }
 0x462   :  { %v2607_v19 = vpop.eup %2606 }
 0x463   :  { %v2011_v48 = vcombine.low %v2605_v54, %v2607_v19 }
 0x465   :  { %2240 = vst.sshfl [vmem:[#allocation13 + $0x8] sm:$0x33 pattern:$0x76325410] %v2011_v48 }
 0x466   :  { %2751 = shalt.err (!%p2748_p10)
}
 0x467   :  { %s2752_s24 = scalar_lea.hbm %s3015_s9, 192 }
 0x468   :  { %p2753_p11 = scmp.ne.s32.totalorder %s3015_s9, %s2752_s24  ;;  %p2756_p12 = scmp.lt.u32.totalorder %s2752_s24, %s3015_s9 }
 0x46a   :  { %p2758_p13 = pnand %p2756_p12, %p2753_p11 }
 0x46c   :  { %2761 = shalt.err (!%p2758_p13)
}
 0x46d   :  { %2032 = dma.vmem_to_hbm [thread:$0]  %s2030_s20, 192, %s3015_s9, [#allocation4]  }
 0x46e   :  { %2770 = dma.done.wait [#allocation4], 192  }
 0x46f   :  { %2771 = vsyncadd [#allocation4], 4294967104 }
 0x470   :  { %2036 = vsyncpa [#allocation3], 1 }
 0x471   :  { %2037 = vsyncpa [#allocation6], 1 }
 0x472   :  { %2038 = vsyncpa [#allocation9], 1 }
 0x473   :  { %2039 = vsyncpa [#allocation12], 1 }
 0x474   :  { %2040 = vsyncpa [#allocation4], 1 }

</bundles_post_ra>
